<compile_context>
chip_gen: v7x
topology: tpu7x:2x2x1
jax: 0.10.0
libtpu: 0.0.40
codegen_flags: <defaults>
</compile_context>

<pallas_src>
import functools

import jax
import jax.numpy as jnp
from jax.experimental import pallas as pl
from jax.experimental.pallas import tpu as pltpu


def _noise_kernel(x_ref, n_ref, w_ref, o_ref, *, cb, sub, compute_dtype, w_resident):
    # x_ref: (1, CB, TL)  tile of x for (batch, channel-block, spatial-tile)
    # n_ref: (1, 1,  TL)  tile of noise (channel-broadcast, VMEM-resident across c)
    # w_ref: resident: (C_pad, 1) full weight column; else (CB, TL) lane-expanded tile
    # o_ref: (1, CB, TL)
    x = x_ref[...].astype(compute_dtype)
    n = n_ref[...].astype(compute_dtype)
    if w_resident:
        idx = pl.program_id(2) * cb
        if cb % sub == 0:
            idx = pl.multiple_of(idx, sub)
        w = w_ref[pl.ds(idx, cb), :].astype(compute_dtype)      # (CB, 1)
    else:
        w = w_ref[...].astype(compute_dtype)                    # (CB, TL)
    o_ref[...] = (x + w[None, :, :] * n).astype(o_ref.dtype)


def _hw_caps():
    """(scoped-VMEM budget, bf16-native-VPU) for the current chip generation."""
    kind = ""
    try:
        kind = jax.devices()[0].device_kind.lower()
    except Exception:
        pass
    newgen = ("v6" in kind) or ("v7" in kind)
    scoped_vmem = (32 << 20) if newgen else (16 << 20)   # conservative for v5e/older/unknown
    return scoped_vmem, newgen


def noise_layer(x, weight, noise=None, key=None, use_pallas=None, block_cap_bytes=None):
    """Pallas implementation of NoiseLayer.forward.

    x:      (B, C, H, W)
    weight: (C,)
    noise:  optional (B, 1, H, W); if None, sampled from `key` (like torch.randn).
    use_pallas: True/False to force a path; None = auto (jnp fallback for tiny inputs).
    block_cap_bytes: override the per-block byte budget (mainly for testing).
    """
    B, C, H, W = x.shape
    if noise is None:
        if key is None:
            raise ValueError(
                "noise_layer: pass `noise` or a PRNG `key` when noise is None "
                "(hard-coding a seed would make the 'random' noise identical every call)."
            )
        # TODO(synk): generate noise in-kernel (pltpu.prng_seed + pltpu.stateful_normal
        # into a per-(batch, spatial-tile) VMEM scratch) to skip this extra HBM pass.
        noise = jax.random.normal(key, (B, 1, H, W), dtype=x.dtype)

    HW = H * W
    itemsize = jnp.dtype(x.dtype).itemsize

    if use_pallas is None:
        # Below ~0.5 MiB the fused XLA elementwise op beats any Pallas launch.
        use_pallas = (B * C * HW * itemsize) >= (1 << 19)
    if not use_pallas:
        return x + weight.reshape(1, C, 1, 1) * noise

    scoped_vmem, bf16_native = _hw_caps()
    if block_cap_bytes is None:
        # x and out blocks are each double-buffered (4 big buffers) + small
        # noise/weight blocks + slack:  ~2 MiB/block on v5e, ~6 MiB on v6e/v7x.
        block_cap_bytes = max(1 << 20, (scoped_vmem - (8 << 20)) // 4)

    compute_dtype = x.dtype if (x.dtype == jnp.float32 or bf16_native) else jnp.float32
    sub = max(8, 32 // itemsize)        # packed-sublane multiple: 8 f32, 16 bf16, 32 i8

    # ---- small-spatial fold: put >=128 (ideally ~1024) elements on the lane axis ----
    G = 1
    if HW < 128:
        target = max(1, min(C, 1024 // max(HW, 1)))
        for g in range(target, 0, -1):
            if C % g == 0:
                G = g
                break
    Cg = C // G
    L = G * HW

    x3 = x.reshape(B, Cg, L)
    n3 = noise.reshape(B, 1, HW)
    if G > 1:
        n3 = jnp.tile(n3, (1, 1, G))                         # (B, 1, L)
        w2 = jnp.repeat(weight, HW).reshape(Cg, L)           # lane-expanded weights
        w_resident = False
    else:
        w2 = weight.reshape(C, 1)
        w_resident = True

    # ---- lane tile: as long as possible (fewer strided DMA rows, wide unmasked vst) ----
    max_tl = max(128, (block_cap_bytes // (sub * itemsize)) // 128 * 128)
    TL = L if L <= max_tl else max_tl
    n_tl = -(-L // TL)

    # v7x megacore: make sure the "parallel" axes (batch, spatial-tile) give >=2 iterations.
    if B * n_tl < 2 and L >= 256:
        TL = min(TL, ((-(-L // 2)) + 127) // 128 * 128)
        n_tl = -(-L // TL)

    # ---- channel block: fill the remaining budget, rounded to the sublane multiple ----
    max_cb = max(1, block_cap_bytes // (TL * itemsize))
    if Cg <= max_cb:
        CB = Cg
    else:
        CB = max(sub, (max_cb // sub) * sub)
        if CB >= Cg:
            CB = Cg
    n_cb = -(-Cg // CB)

    if w_resident:
        c_pad = n_cb * CB
        if c_pad != Cg:
            w2 = jnp.pad(w2, ((0, c_pad - Cg), (0, 0)))
        # Constant block index -> DMA'd once, stays VMEM-resident for the whole grid.
        w_spec = pl.BlockSpec((c_pad, 1), lambda b, t, c: (0, 0))
    else:
        w_spec = pl.BlockSpec((CB, TL), lambda b, t, c: (c, t))

    grid = (B, n_tl, n_cb)
    # Channel-block innermost keeps the noise tile VMEM-resident across it; if batch and
    # spatial tiles cannot feed both v7x TensorCores, let the channel axis shard too.
    chan_sem = "parallel" if (B * n_tl < 2) else "arbitrary"

    kern = functools.partial(_noise_kernel, cb=CB, sub=sub,
                             compute_dtype=compute_dtype, w_resident=w_resident)

    out3 = pl.pallas_call(
        kern,
        out_shape=jax.ShapeDtypeStruct((B, Cg, L), x.dtype),
        grid=grid,
        in_specs=[
            pl.BlockSpec((1, CB, TL), lambda b, t, c: (b, c, t)),   # x
            pl.BlockSpec((1, 1, TL), lambda b, t, c: (b, 0, t)),    # noise (channel-broadcast)
            w_spec,                                                 # weight
        ],
        out_specs=pl.BlockSpec((1, CB, TL), lambda b, t, c: (b, c, t)),
        compiler_params=pltpu.CompilerParams(
            dimension_semantics=("parallel", "parallel", chan_sem),
        ),
    )(x3, n3, w2)

    return out3.reshape(B, C, H, W)


def _ref(x, weight, noise):
    C = x.shape[1]
    return (x.astype(jnp.float32)
            + weight.astype(jnp.float32).reshape(1, C, 1, 1) * noise.astype(jnp.float32))


if __name__ == "__main__":
    key = jax.random.PRNGKey(0)
    keys = jax.random.split(key, 16)

    # --- 1) small case from the spec (2, 4, 16, 16), forced Pallas path -------------
    B, C, H, W = 2, 4, 16, 16
    x = jax.random.normal(keys[0], (B, C, H, W), dtype=jnp.float32)
    noise = jax.random.normal(keys[1], (B, 1, H, W), dtype=jnp.float32)
    weight = jax.random.normal(keys[2], (C,), dtype=jnp.float32)
    out = jax.block_until_ready(noise_layer(x, weight, noise, use_pallas=True))
    ref = _ref(x, weight, noise)
    assert out.shape == (B, C, H, W)
    assert jnp.allclose(out, ref, atol=1e-6, rtol=1e-6), "mismatch (small)"
    # auto-dispatch path (tiny input -> plain jnp fallback) must also match
    out_auto = jax.block_until_ready(noise_layer(x, weight, noise))
    assert jnp.allclose(out_auto, ref, atol=1e-6, rtol=1e-6), "mismatch (fallback)"

    # --- 2) B=1 case: exercises the megacore lane-split (2 spatial tiles + edge) ----
    B2, C2, H2, W2 = 1, 8, 24, 24
    x2 = jax.random.normal(keys[3], (B2, C2, H2, W2), dtype=jnp.float32)
    n2 = jax.random.normal(keys[4], (B2, 1, H2, W2), dtype=jnp.float32)
    w2 = jax.random.normal(keys[5], (C2,), dtype=jnp.float32)
    out2 = jax.block_until_ready(noise_layer(x2, w2, n2, use_pallas=True))
    assert jnp.allclose(out2, _ref(x2, w2, n2), atol=1e-6, rtol=1e-6), "mismatch (lane split)"

    # --- 3) small-spatial fold path (HW = 64 < 128 -> channels folded onto lanes) ---
    B3, C3, H3, W3 = 2, 6, 8, 8
    x3 = jax.random.normal(keys[6], (B3, C3, H3, W3), dtype=jnp.float32)
    n3 = jax.random.normal(keys[7], (B3, 1, H3, W3), dtype=jnp.float32)
    w3 = jax.random.normal(keys[8], (C3,), dtype=jnp.float32)
    out3 = jax.block_until_ready(noise_layer(x3, w3, n3, use_pallas=True))
    assert jnp.allclose(out3, _ref(x3, w3, n3), atol=1e-6, rtol=1e-6), "mismatch (fold)"

    # --- 4) channel-blocked path: force a small block cap so CB < C (resident slice) -
    B4, C4, H4, W4 = 2, 32, 32, 32
    x4 = jax.random.normal(keys[9], (B4, C4, H4, W4), dtype=jnp.float32)
    n4 = jax.random.normal(keys[10], (B4, 1, H4, W4), dtype=jnp.float32)
    w4 = jax.random.normal(keys[11], (C4,), dtype=jnp.float32)
    out4 = jax.block_until_ready(
        noise_layer(x4, w4, n4, use_pallas=True, block_cap_bytes=64 << 10))
    assert jnp.allclose(out4, _ref(x4, w4, n4), atol=1e-6, rtol=1e-6), "mismatch (chan blocks)"

    # --- 5) bf16 path: native-dtype compute on v6e/v7x, f32 upcast on older chips ----
    B5, C5, H5, W5 = 2, 8, 16, 16
    x5 = jax.random.normal(keys[12], (B5, C5, H5, W5), dtype=jnp.bfloat16)
    n5 = jax.random.normal(keys[13], (B5, 1, H5, W5), dtype=jnp.bfloat16)
    w5 = jax.random.normal(keys[14], (C5,), dtype=jnp.bfloat16)
    out5 = jax.block_until_ready(noise_layer(x5, w5, n5, use_pallas=True))
    assert out5.dtype == jnp.bfloat16
    assert jnp.allclose(out5.astype(jnp.float32), _ref(x5, w5, n5),
                        atol=5e-2, rtol=5e-2), "mismatch (bf16)"

    print("KERNEL_OK")
</pallas_src>

<mosaic_0001>
module attributes {stable_mosaic.version = 11 : i64} {
  func.func @_noise_kernel(%arg0: i32, %arg1: i32, %arg2: i32, %arg3: memref<1x4x256xf32, #tpu.memory_space<vmem>>, %arg4: memref<1x1x256xf32, #tpu.memory_space<vmem>>, %arg5: memref<4x1xf32, #tpu.memory_space<vmem>>, %arg6: memref<1x4x256xf32, #tpu.memory_space<vmem>>) attributes {dimension_semantics = [#tpu.dimension_semantics<parallel>, #tpu.dimension_semantics<parallel>, #tpu.dimension_semantics<arbitrary>], iteration_bounds = array<i64: 2, 1, 1>, scalar_prefetch = 0 : i64, scratch_operands = 0 : i64, tpu.core_type = #tpu.core_type<tc>, window_params = [{transform_indices = @transform_0, window_bounds = array<i64: 1, 4, 256>}, {transform_indices = @transform_1, window_bounds = array<i64: 1, 1, 256>}, {pipeline_mode = #tpu.pipeline_mode<synchronous>, transform_indices = @transform_2, window_bounds = array<i64: 4, 1>}, {transform_indices = @transform_3, window_bounds = array<i64: 1, 4, 256>}]} {
    %c0 = arith.constant 0 : index
    %c0_0 = arith.constant 0 : index
    %c0_1 = arith.constant 0 : index
    %0 = vector.load %arg3[%c0, %c0_0, %c0_1] : memref<1x4x256xf32, #tpu.memory_space<vmem>>, vector<1x4x256xf32>
    %c0_2 = arith.constant 0 : index
    %c0_3 = arith.constant 0 : index
    %c0_4 = arith.constant 0 : index
    %1 = vector.load %arg4[%c0_2, %c0_3, %c0_4] : memref<1x1x256xf32, #tpu.memory_space<vmem>>, vector<1x1x256xf32>
    %c4_i32 = arith.constant 4 : i32
    %2 = arith.muli %arg2, %c4_i32 : i32
    %3 = arith.index_cast %2 : i32 to index
    %c0_5 = arith.constant 0 : index
    %4 = vector.load %arg5[%3, %c0_5] : memref<4x1xf32, #tpu.memory_space<vmem>>, vector<4x1xf32>
    %5 = vector.shape_cast %4 : vector<4x1xf32> to vector<1x4x1xf32>
    %6 = vector.broadcast %5 : vector<1x4x1xf32> to vector<1x4x256xf32>
    %7 = vector.broadcast %1 : vector<1x1x256xf32> to vector<1x4x256xf32>
    %8 = arith.mulf %6, %7 : vector<1x4x256xf32>
    %9 = arith.addf %0, %8 : vector<1x4x256xf32>
    %c0_6 = arith.constant 0 : index
    %c0_7 = arith.constant 0 : index
    %c0_8 = arith.constant 0 : index
    %10 = vector.load %arg6[%c0_6, %c0_7, %c0_8] : memref<1x4x256xf32, #tpu.memory_space<vmem>>, vector<1x4x256xf32>
    tpu.vector_store %arg6[%c0_6, %c0_7, %c0_8], %9 {strides = array<i32>} : memref<1x4x256xf32, #tpu.memory_space<vmem>>, vector<1x4x256xf32>,
    return
  }
  func.func @transform_0(%arg0: i32, %arg1: i32, %arg2: i32) -> (i32, i32, i32) {
    %c0_i32 = arith.constant 0 : i32
    return %arg0, %arg2, %arg1 : i32, i32, i32
  }
  func.func @transform_1(%arg0: i32, %arg1: i32, %arg2: i32) -> (i32, i32, i32) {
    %c0_i32 = arith.constant 0 : i32
    %c0_i32_0 = arith.constant 0 : i32
    return %arg0, %c0_i32, %arg1 : i32, i32, i32
  }
  func.func @transform_2(%arg0: i32, %arg1: i32, %arg2: i32) -> (i32, i32) {
    %c0_i32 = arith.constant 0 : i32
    %c0_i32_0 = arith.constant 0 : i32
    %c0_i32_1 = arith.constant 0 : i32
    return %c0_i32, %c0_i32_0 : i32, i32
  }
  func.func @transform_3(%arg0: i32, %arg1: i32, %arg2: i32) -> (i32, i32, i32) {
    %c0_i32 = arith.constant 0 : i32
    return %arg0, %arg2, %arg1 : i32, i32, i32
  }
}

</mosaic_0001>

<bundles_post_ra>
// kernel: tpu_custom_call.1
= control target key start
LH: loop header
LB: loop body
LE: loop exit
PB: predicated region body
PF: predicated region fallthrough
CT: control target
= control target key end

     0   :  { %8 = vsyncpa [#allocation3], 0  ;;  %s808_s0 = inlined_call_operand.hbm [shape: f32[2,4,256], index: 0, kind: input, shape index: {}]   ;;  %s809_s1 = inlined_call_operand.vmem [shape: f32[2,1,256], index: 1, kind: input, shape index: {}]   ;;  %s810_s2 = inlined_call_operand.vmem [shape: f32[4,1], index: 2, kind: input, shape index: {}]   ;;  %s811_s3 = inlined_call_operand.hbm [shape: f32[2,4,256], index: 3, kind: output, shape index: {}]  }
   0x1   :  { %10 = vsyncpa [#allocation3 + $0x1], 0 }
   0x2   :  { %11 = vsyncpa [#allocation4], 0 }
   0x3   :  { %13 = vsyncpa [#allocation4 + $0x1], 0  ;;  %s628_s12 = smov 0   ;;  %s630_s13 = smov 0  }
   0x4   :  { %s632_s14 = smov 0   ;;  %s634_s15 = smov 0  }
   0x5   :  { %s636_s16 = smov 0   ;;  %s638_s17 = smov 0  }
   0x6 LB: > { %s409_s18 = sadd.s32 4294967295, %s603_s17   ;;  %s410_s19 = sadd.s32 4294967294, %s603_s17   ;;  %s603_s17 = sphi %s638_s17, %s19_s17   ;;  %s599_s16 = sphi %s636_s16, %s827_s16   ;;  %s595_s15 = sphi %s634_s15, %s826_s15   ;;  %s591_s14 = sphi %s632_s14, %s825_s14   ;;  %s587_s13 = sphi %s630_s13, %s824_s13   ;;  %s583_s12 = sphi %s628_s12, %s823_s12  }
   0x7   : > { %s38_s20 = sadd.s32 1, %s599_s16  ;;  %s49_s21 = sadd.s32 1, %s591_s14 }
   0x8   : > { %p40_p0 = scmp.ge.s32.totalorder %s38_s20, 2  ;;  %p56_p1 = scmp.ne.s32.totalorder %s591_s14, %s587_s13 }
   0x9   : > { %p57_p2 = scmp.eq.s32.totalorder %s603_s17, 0  ;;  %p62_p3 = scmp.ne.s32.totalorder %s587_s13, %s583_s12 }
   0xa   : > { %s829_s20 = smov (%p40_p0, %s38_s20), 0  ;;  %p63_p5 = scmp.eq.s32.totalorder %s409_s18, 0 }
   0xb   : > { %p669_p4 = por %p57_p2, %p56_p1  ;;  %s42_s23 = ssub.s32 %s599_s16, %s829_s20 }
   0xc   : > { %p139_p6 = scmp.eq.s32.totalorder %s409_s18, 1  ;;  %p47_p7 = scmp.eq.s32.totalorder %s42_s23, 0 }
   0xd   : > { %p675_p8 = por %p63_p5, %p62_p3  ;;  %p145_p10 = scmp.eq.s32.totalorder %s410_s19, 1 }
   0xe   : > { %p679_p9 = por %p139_p6, %p56_p1  ;;  %p439_p13 = scmp.lt.s32.totalorder %s603_s17, 2 }
   0xf   : > { %s684_s26 = scalar_select %p47_p7, %s591_s14, %s49_s21  }
  0x10   : > { %s815_s25 = scalar_select %p679_p9, 1, 0 }
  0x11   : > { %p686_p11 = por %p145_p10, %p62_p3  ;;  %s168_s28 = sand.u32 1, %s591_s14  }
  0x12   : > { %s413_s29 = sshll.u32 %s168_s28, 3  ;;  %s425_s30 = sshll.u32 %s599_s16, 7 }
  0x13   : > { %s816_s27 = scalar_select %p686_p11, 1, 0 }
  0x14   : > { %s697_s6 = scalar_lea.hbm %s808_s0, %s425_s30  ;;  %s172_s7 = scalar_lea.vmem [#allocation2], %s413_s29 }
  0x15   : > { %s184_s8 = sshll.u32 %s172_s7, 4  ;;  %p703_p0 = pnand %p439_p13, %p669_p4  ;;  %s699_s8 = int_to_ptr.vmem [resolvable:$true] %s184_s8 }
  0x16   : > { %s169_s10 = scalar_lea.sflag [#allocation3], %s168_s28  ;;  %s491_s11 = scalar_lea.hbm %s697_s6, 128 }
  0x17   : > { %p492_p3 = scmp.ne.s32.totalorder %s697_s6, %s491_s11  ;;  %p493_p5 = pneg %p703_p0 }
  0x18   : > { %s496_s21 = scalar_lea.hbm %s808_s0, 256  ;;  %p497_p4 = scmp.lt.u32.totalorder %s697_s6, %s808_s0 }
  0x19   : > { %p494_p6 = pnand %p493_p5, %p492_p3  ;;  %p498_p10 = scmp.lt.u32.totalorder %s496_s21, %s491_s11 }
  0x1a   : > { %p500_p12 = scmp.lt.u32.totalorder %s491_s11, %s697_s6 }
  0x1b   : > { %p495_p7 = pneg %p494_p6  ;;  %p499_p13 = por %p498_p10, %p497_p4 }
  0x1d   : > { %p501_p1 = por %p500_p12, %p499_p13 }
  0x1f   : > { %p502_p2 = pnand %p501_p1, %p495_p7 }
  0x21   : > { %505 = shalt.err (!%p502_p2)
}
  0x22   : > { %s506_s28 = scalar_lea.vmem %s699_s8, 128  ;;  %s605_s29 = smov [#allocation2]  }
  0x23   : > { %p507_p3 = scmp.ne.s32.totalorder %s699_s8, %s506_s28  ;;  %s511_s30 = sshll.u32 %s605_s29, 4  ;;  %s512_s30 = int_to_ptr.vmem [resolvable:$false] %s511_s30 }
  0x24   : > { %s513_s4 = scalar_lea.vmem %s512_s30, 256  ;;  %p514_p9 = scmp.lt.s32.totalorder %s699_s8, %s512_s30 }
  0x25   : > { %p509_p6 = pnand %p507_p3, %p493_p5  ;;  %p515_p4 = scmp.lt.s32.totalorder %s513_s4, %s506_s28 }
  0x27   : > { %p510_p11 = pneg %p509_p6  ;;  %p516_p10 = por %p515_p4, %p514_p9 }
  0x29   : > { %p517_p12 = pnand %p516_p10, %p510_p11 }
  0x2b   : > { %520 = shalt.err (!%p517_p12)
}
  0x2c   : > { %434 = dma.hbm_to_vmem [thread:$0]  (!%p703_p0), %s697_s6, 128, %s699_s8, %s169_s10  }
  0x2d   : > { %p818_p1 = scmp.lt.s32.totalorder %s603_s17, 3  ;;  %p819_p2 = scmp.ge.s32.totalorder %s603_s17, 1 }
  0x2f   : > { %p202_p5 = pnand %p819_p2, %p818_p1 }
  0x30   : > { %s739_s5 = sand.u32 (!%p202_p5), 1, %s587_s13  }
  0x31   : > { %205 = sbr.rel (%p202_p5) target bundleno = 207 (0xcf), region = 32  ;;  %s417_s7 = sshll.u32 (!%p202_p5), %s739_s5, 3 }
  0x32   : > { %s208_s11 = scalar_lea.sflag (!%p202_p5), [#allocation3], %s739_s5  ;;  %s211_s18 = scalar_lea.vmem (!%p202_p5), [#allocation2], %s417_s7 }
  0x38   : > { %574 = dma.done.wait (%p675_p8), %s208_s11, 128  }
  0x39   : > { %576 = vsyncadd (%p675_p8), %s208_s11, 4294967168  ;;  %v606_v0 = vmov 0   ;;  %v257_v1 = vld [vmem:[%s810_s2] sm:$0xf]  ;;  %p244_p9 = scmp.lt.s32.totalorder %s595_s15, 1  ;;  %v264_v2 = vlaneseq  ;;  %s426_s22 = sshll.u32 %s595_s15, 7 }
  0x3a   : > { %490 = vset.pattern.permute.xlu0 %v606_v0  ;;  %v253_v12 = vld [vmem:[%s211_s18] sm:$0xff]  ;;  %s241_s23 = scalar_lea.vmem [#allocation5], %s417_s7  ;;  %s759_s4 = scalar_lea.hbm %s811_s3, %s426_s22 }
  0x3b   : > { %260 = vperm.xlu0 %490, %v257_v1   ;;  %s245_s9 = scalar_select %p244_p9, %s595_s15, 1  ;;  %v265_v3 = vshrl.u32 %v264_v2, 7 }
  0x3c   : > { %s301_s28 = sshll.u32 %s241_s23, 4  ;;  %s283_s11 = scalar_lea.sflag [#allocation4], %s739_s5  ;;  %s761_s28 = int_to_ptr.vmem [resolvable:$true] %s301_s28 }
  0x3d   : > { %s419_s10 = sshll.u32 %s245_s9, 1  ;;  %v266_v4 = vsub.s32 0, %v265_v3  ;;  %v270_v5 = vsub.s32 1, %v265_v3  ;;  %s521_s6 = scalar_lea.vmem %s761_s28, 128 }
  0x3e   : > { %s250_s24 = scalar_lea.vmem %s809_s1, %s419_s10  ;;  %p522_p8 = scmp.ne.s32.totalorder %s761_s28, %s521_s6 }
  0x3f   : > { %v254_v6 = vld [vmem:[%s250_s24] sm:$0x3]  ;;  %p820_p11 = scmp.ne.s32.totalorder %s815_s25, 0  ;;  %s607_s15 = smov [#allocation5]  }
  0x40   : > { %v267_v7 = vrot.slane %v254_v6, %v266_v4  ;;  %v271_v8 = vrot.slane %v254_v6, %v270_v5  ;;  %s525_s7 = sshll.u32 %s607_s15, 4  ;;  %s526_s7 = int_to_ptr.vmem [resolvable:$false] %s525_s7 }
  0x41   : > { %p523_p0 = pnand %p522_p8, %p820_p11  ;;  %s527_s18 = scalar_lea.vmem %s526_s7, 256 }
  0x42   : > { %p528_p13 = scmp.lt.s32.totalorder %s761_s28, %s526_s7  ;;  %p529_p3 = scmp.lt.s32.totalorder %s527_s18, %s521_s6 }
  0x43   : > { %p524_p7 = pneg %p523_p0 }
  0x44   : > { %p530_p6 = por %p529_p3, %p528_p13 }
  0x46   : > { %p531_p4 = pnand %p530_p6, %p524_p7 }
  0xba   : > { %v261_v9 = vpop.permute.xlu0 %260 }
  0xbb   : > { %v274_v10 = vmul.f32 %v267_v7, %v261_v9  ;;  %v275_v11 = vmul.f32 %v271_v8, %v261_v9 }
  0xbd   : > { %v278_v13 = vcombine.low %v274_v10, %v275_v11 }
  0xbf   : > { %v280_v14 = vadd.f32 %v278_v13, %v253_v12 }
  0xc1   : > { %281 = vst [vmem:[%s241_s23] sm:$0xff] %v280_v14 }
  0xc2   : > { %534 = shalt.err (!%p531_p4)
}
  0xc3   : > { %s535_s5 = scalar_lea.hbm %s759_s4, 128  ;;  %s539_s10 = scalar_lea.hbm %s811_s3, 256 }
  0xc4   : > { %p536_p10 = scmp.ne.s32.totalorder %s759_s4, %s535_s5  ;;  %p540_p2 = scmp.lt.u32.totalorder %s759_s4, %s811_s3 }
  0xc5   : > { %p541_p5 = scmp.lt.u32.totalorder %s539_s10, %s535_s5  ;;  %p543_p8 = scmp.lt.u32.totalorder %s535_s5, %s759_s4 }
  0xc6   : > { %p537_p12 = pnand %p536_p10, %p820_p11 }
  0xc7   : > { %p542_p9 = por %p541_p5, %p540_p2 }
  0xc8   : > { %p538_p1 = pneg %p537_p12 }
  0xc9   : > { %p544_p0 = por %p543_p8, %p542_p9 }
  0xcb   : > { %p545_p7 = pnand %p544_p0, %p538_p1 }
  0xcd   : > { %548 = shalt.err (!%p545_p7)
}
  0xce   : > { %429 = dma.vmem_to_hbm [thread:$0]  (%p820_p11), %s761_s28, 128, %s759_s4, %s283_s11  }
  0xcf PF: > { %s313_s24 = sand.u32 1, %s583_s12   ;;  %p821_p13 = scmp.ne.s32.totalorder %s816_s27, 0 }
  0xd0   : > { %p822_p3 = scmp.ge.s32.totalorder %s603_s17, 2  ;;  %s314_s22 = scalar_lea.sflag [#allocation4], %s313_s24 }
  0xd2   : > { %p436_p6 = pnand %p822_p3, %p821_p13 }
  0xd4   : > { %578 = dma.done.wait (!%p436_p6), %s314_s22, 128  }
  0xd5   : > { %580 = vsyncadd (!%p436_p6), %s314_s22, 4294967168  ;;  %s19_s17 = sadd.s32 1, %s603_s17   ;;  %s823_s12 = smov %s587_s13 }
  0xd6   : > { %p16_p4 = scmp.ge.s32.totalorder %s19_s17, 4   ;;  %s824_s13 = smov %s591_s14 }
  0xd7   : > { %s825_s14 = smov %s684_s26  ;;  %s826_s15 = smov %s599_s16 }
  0xd8   : > { %s827_s16 = smov %s829_s20  ;;  %18 = sbr.rel (!%p16_p4) target bundleno = 6 (0x6), region = 81 }
  0xdf   :  { %319 = vsyncpa [#allocation3], 1 }
  0xe0   :  { %321 = vsyncpa [#allocation3 + $0x1], 1 }
  0xe1   :  { %322 = vsyncpa [#allocation4], 1 }
  0xe2   :  { %324 = vsyncpa [#allocation4 + $0x1], 1 }

</bundles_post_ra>
